<compile_context>
chip_gen: v6e
topology: v6e:2x2x1
jax: 0.10.0
libtpu: 0.0.40
codegen_flags: <defaults>
</compile_context>

<pallas_src>
import functools

import jax
import jax.numpy as jnp
from jax.experimental import pallas as pl
from jax.experimental.pallas import tpu as pltpu

_LN2 = 0.6931471805599453


def _js_rows_kernel(p_ref, q_ref, out_ref, *, n_rows):
    i = pl.program_id(0)
    tm = p_ref.shape[0]

    p_logits = p_ref[...].astype(jnp.float32)
    q_logits = q_ref[...].astype(jnp.float32)

    def softmax_and_logsoftmax(z):
        zmax = jnp.max(z, axis=-1, keepdims=True)
        zs = z - zmax
        e = jnp.exp(zs)                                  # full-tile EUP op
        se = jnp.sum(e, axis=-1, keepdims=True)          # (TM, 1)
        log_z = zs - jnp.log(se)                         # only a (TM,1) log
        prob = e * (1.0 / se)                            # EXACT per-row recip
        return prob, log_z

    p, log_p = softmax_and_logsoftmax(p_logits)
    q, log_q = softmax_and_logsoftmax(q_logits)

    s = p + q
    # log_m = log((p+q)/2) = log(max(p+q, tiny)) - ln2.  The clamp only acts
    # where both probabilities underflowed to 0 (those terms multiply by 0),
    # so it never changes results where p+q > 0 (smallest-normal f32 epsilon).
    tiny = jnp.float32(jnp.finfo(jnp.float32).tiny)
    log_m = jnp.log(jnp.maximum(s, tiny)) - jnp.float32(_LN2)

    # Algebraic form of  where(p>0, p*(log_p-log_m), 0) + where(q>0, ...):
    # log_p/log_q are finite (log-space softmax), so p*log_p == 0 exactly when
    # p underflows -> matches PyTorch kl_div zero-target semantics.
    term = p * log_p + q * log_q - s * log_m
    row_kl = jnp.sum(term, axis=-1, keepdims=True)       # (TM, 1)

    # Zero rows beyond the true batch (ragged last tile reads unspecified DMA
    # data; the select also suppresses any inf/NaN produced there).
    row_ids = i * tm + jax.lax.broadcasted_iota(jnp.int32, row_kl.shape, 0)
    out_ref[...] = jnp.where(row_ids < n_rows, row_kl, 0.0)


def _round_up(x, m):
    return ((x + m - 1) // m) * m


def _vmem_capacity_bytes():
    # Generation-aware: 64 MiB/TC on v7x, 128 MiB on v5e/v6e.  Fall back to a
    # conservative value when not running on a real TPU (e.g. interpret mode).
    try:
        return int(pltpu.get_tpu_info().vmem_capacity_bytes)
    except Exception:
        return 128 * 1024 * 1024


def _vmem_plan(c, in_itemsize):
    """Pick (block_rows, vmem_limit_bytes) from the chip's VMEM capacity."""
    cap = _vmem_capacity_bytes()
    # Scoped limit: ~3/4 of physical VMEM (48 MiB on v7x, ~96 MiB on v5e/v6e),
    # then budget tiles with extra headroom for compiler scratch.
    vmem_limit = min(cap * 3 // 4, 100 << 20)
    budget = vmem_limit - (8 << 20)
    # Live bytes per row of C: 2 inputs x 2 pipeline buffers (input dtype)
    # + ~8 full-tile f32 temporaries (e, prob, log, term for each side).
    per_row = c * (2 * 2 * in_itemsize + 8 * 4)
    if per_row * 16 > budget:
        # TODO(synk): add class-dimension chunking (online log-sum-exp over C)
        # for vocab-scale C; for now fail loudly instead of VMEM-OOMing.
        raise NotImplementedError(
            f"num_classes={c} too large for a single-row-block kernel "
            f"(needs ~{per_row * 16 / 2**20:.1f} MiB > {budget / 2**20:.1f} MiB budget)")
    tm = max(16, min(1024, (budget // per_row) // 16 * 16))
    return tm, vmem_limit


def js_divergence1(p_logits, q_logits, *, block_rows=None):
    """JS divergence between softmax(p_logits) and softmax(q_logits) -> scalar."""
    assert p_logits.shape == q_logits.shape and p_logits.ndim == 2
    n, c = p_logits.shape

    itemsize = max(p_logits.dtype.itemsize, q_logits.dtype.itemsize)
    row_align = 8 if itemsize >= 4 else 16   # bf16/fp16 rows pack in 16s
    tm_auto, vmem_limit = _vmem_plan(c, itemsize)

    if block_rows is None:
        tm = min(tm_auto, _round_up(n, row_align))
        # v7x megacore: keep >= 2 grid steps when the batch allows it, so the
        # "parallel" axis can be sharded across both TensorCores.
        if n > row_align:
            tm = min(tm, max(row_align, _round_up(pl.cdiv(n, 2), row_align)))
    else:
        tm = block_rows
        assert tm % row_align == 0 or tm >= n, (
            f"block_rows={tm} must be a multiple of {row_align} or cover the batch")
    if tm >= n:
        tm = n  # single block; "block == full array dim" is always legal

    grid = (pl.cdiv(n, tm),)
    kernel = functools.partial(_js_rows_kernel, n_rows=n)

    bytes_in = n * c * (p_logits.dtype.itemsize + q_logits.dtype.itemsize)
    cost = pl.CostEstimate(
        flops=10 * n * c,
        transcendentals=3 * n * c,
        bytes_accessed=bytes_in + n * 4,
    )

    row_kl = pl.pallas_call(
        kernel,
        out_shape=jax.ShapeDtypeStruct((n, 1), jnp.float32),
        grid=grid,
        in_specs=[
            pl.BlockSpec((tm, c), lambda i: (i, 0)),
            pl.BlockSpec((tm, c), lambda i: (i, 0)),
        ],
        out_specs=pl.BlockSpec((tm, 1), lambda i: (i, 0)),
        compiler_params=pltpu.CompilerParams(
            dimension_semantics=("parallel",),
            vmem_limit_bytes=int(vmem_limit)),
        cost_estimate=cost,
    )(p_logits, q_logits)

    # Tiny reduction + batchmean normalization in the wrapper (negligible cost,
    # keeps the grid axis embarrassingly parallel).
    return jnp.sum(row_kl) * (0.5 / n)


def _js_reference(p_logits, q_logits):
    # Plain-JAX reference for sanity checking.
    p = jax.nn.softmax(p_logits.astype(jnp.float32), axis=-1)
    q = jax.nn.softmax(q_logits.astype(jnp.float32), axis=-1)
    m = 0.5 * (p + q)
    log_m = jnp.log(m)
    n = p_logits.shape[0]
    kl_pm = jnp.sum(p * (jnp.log(p) - log_m)) / n
    kl_qm = jnp.sum(q * (jnp.log(q) - log_m)) / n
    return 0.5 * (kl_pm + kl_qm)


if __name__ == "__main__":
    key = jax.random.PRNGKey(0)
    k1, k2, k3, k4 = jax.random.split(key, 4)

    # Case 1: single-tile shape (batch=8, classes=128), default tiling.
    p1 = jax.random.normal(k1, (8, 128), dtype=jnp.float32)
    q1 = jax.random.normal(k2, (8, 128), dtype=jnp.float32)
    out1 = jax.block_until_ready(js_divergence1(p1, q1))
    ref1 = _js_reference(p1, q1)
    assert jnp.allclose(out1, ref1, rtol=2e-5, atol=2e-6), (out1, ref1)

    # Case 2: forced small blocks -> grid of 3 with a ragged, masked last tile.
    p2 = 3.0 * jax.random.normal(k3, (20, 256), dtype=jnp.float32)
    q2 = 3.0 * jax.random.normal(k4, (20, 256), dtype=jnp.float32)
    out2 = jax.block_until_ready(js_divergence1(p2, q2, block_rows=8))
    ref2 = _js_reference(p2, q2)
    assert jnp.allclose(out2, ref2, rtol=2e-5, atol=2e-6), (out2, ref2)

    # Case 3: same inputs, default heuristic -> >=2 grid steps (megacore path)
    # with a ragged last tile.
    out3 = jax.block_until_ready(js_divergence1(p2, q2))
    assert jnp.allclose(out3, ref2, rtol=2e-5, atol=2e-6), (out3, ref2)

    print("KERNEL_OK")
</pallas_src>

<mosaic_0001>
module attributes {stable_mosaic.version = 11 : i64} {
  func.func @_js_rows_kernel(%arg0: i32, %arg1: memref<8x128xf32, #tpu.memory_space<vmem>>, %arg2: memref<8x128xf32, #tpu.memory_space<vmem>>, %arg3: memref<8x1xf32, #tpu.memory_space<vmem>>) attributes {dimension_semantics = [#tpu.dimension_semantics<parallel>], iteration_bounds = array<i64: 1>, scalar_prefetch = 0 : i64, scratch_operands = 0 : i64, tpu.core_type = #tpu.core_type<tc>, window_params = [{transform_indices = @transform_0, window_bounds = array<i64: 8, 128>}, {transform_indices = @transform_1, window_bounds = array<i64: 8, 128>}, {transform_indices = @transform_2, window_bounds = array<i64: 8, 1>}]} {
    %c0 = arith.constant 0 : index
    %c0_0 = arith.constant 0 : index
    %0 = vector.load %arg1[%c0, %c0_0] : memref<8x128xf32, #tpu.memory_space<vmem>>, vector<8x128xf32>
    %c0_1 = arith.constant 0 : index
    %c0_2 = arith.constant 0 : index
    %1 = vector.load %arg2[%c0_1, %c0_2] : memref<8x128xf32, #tpu.memory_space<vmem>>, vector<8x128xf32>
    %cst = arith.constant dense<0xFF800000> : vector<8xf32>
    %2 = vector.multi_reduction <maximumf>, %0, %cst [1] : vector<8x128xf32> to vector<8xf32>
    %3 = vector.shape_cast %2 : vector<8xf32> to vector<8x1xf32>
    %4 = vector.broadcast %3 : vector<8x1xf32> to vector<8x128xf32>
    %5 = arith.subf %0, %4 : vector<8x128xf32>
    %6 = math.exp %5 : vector<8x128xf32>
    %cst_3 = arith.constant dense<0.000000e+00> : vector<8xf32>
    %7 = vector.multi_reduction <add>, %6, %cst_3 [1] : vector<8x128xf32> to vector<8xf32>
    %8 = vector.shape_cast %7 : vector<8xf32> to vector<8x1xf32>
    %9 = math.log %8 : vector<8x1xf32>
    %10 = vector.broadcast %9 : vector<8x1xf32> to vector<8x128xf32>
    %11 = arith.subf %5, %10 : vector<8x128xf32>
    %cst_4 = arith.constant 1.000000e+00 : f32
    %12 = vector.broadcast %cst_4 : f32 to vector<8x1xf32>
    %13 = arith.divf %12, %8 : vector<8x1xf32>
    %14 = vector.broadcast %13 : vector<8x1xf32> to vector<8x128xf32>
    %15 = arith.mulf %6, %14 : vector<8x128xf32>
    %cst_5 = arith.constant dense<0xFF800000> : vector<8xf32>
    %16 = vector.multi_reduction <maximumf>, %1, %cst_5 [1] : vector<8x128xf32> to vector<8xf32>
    %17 = vector.shape_cast %16 : vector<8xf32> to vector<8x1xf32>
    %18 = vector.broadcast %17 : vector<8x1xf32> to vector<8x128xf32>
    %19 = arith.subf %1, %18 : vector<8x128xf32>
    %20 = math.exp %19 : vector<8x128xf32>
    %cst_6 = arith.constant dense<0.000000e+00> : vector<8xf32>
    %21 = vector.multi_reduction <add>, %20, %cst_6 [1] : vector<8x128xf32> to vector<8xf32>
    %22 = vector.shape_cast %21 : vector<8xf32> to vector<8x1xf32>
    %23 = math.log %22 : vector<8x1xf32>
    %24 = vector.broadcast %23 : vector<8x1xf32> to vector<8x128xf32>
    %25 = arith.subf %19, %24 : vector<8x128xf32>
    %cst_7 = arith.constant 1.000000e+00 : f32
    %26 = vector.broadcast %cst_7 : f32 to vector<8x1xf32>
    %27 = arith.divf %26, %22 : vector<8x1xf32>
    %28 = vector.broadcast %27 : vector<8x1xf32> to vector<8x128xf32>
    %29 = arith.mulf %20, %28 : vector<8x128xf32>
    %30 = arith.addf %15, %29 : vector<8x128xf32>
    %cst_8 = arith.constant 1.17549435E-38 : f32
    %31 = vector.broadcast %cst_8 : f32 to vector<8x128xf32>
    %32 = arith.maximumf %30, %31 : vector<8x128xf32>
    %33 = math.log %32 : vector<8x128xf32>
    %cst_9 = arith.constant 0.693147182 : f32
    %34 = vector.broadcast %cst_9 : f32 to vector<8x128xf32>
    %35 = arith.subf %33, %34 : vector<8x128xf32>
    %36 = arith.mulf %15, %11 : vector<8x128xf32>
    %37 = arith.mulf %29, %25 : vector<8x128xf32>
    %38 = arith.addf %36, %37 : vector<8x128xf32>
    %39 = arith.mulf %30, %35 : vector<8x128xf32>
    %40 = arith.subf %38, %39 : vector<8x128xf32>
    %cst_10 = arith.constant dense<0.000000e+00> : vector<8xf32>
    %41 = vector.multi_reduction <add>, %40, %cst_10 [1] : vector<8x128xf32> to vector<8xf32>
    %42 = vector.shape_cast %41 : vector<8xf32> to vector<8x1xf32>
    %c8_i32 = arith.constant 8 : i32
    %43 = arith.muli %arg0, %c8_i32 : i32
    %44 = tpu.iota {dimensions = array<i32: 0>} : vector<8x1xi32>
    %45 = vector.broadcast %43 : i32 to vector<8x1xi32>
    %46 = arith.addi %45, %44 : vector<8x1xi32>
    %c8_i32_11 = arith.constant 8 : i32
    %47 = vector.broadcast %c8_i32_11 : i32 to vector<8x1xi32>
    %48 = arith.cmpi slt, %46, %47 : vector<8x1xi32>
    %cst_12 = arith.constant 0.000000e+00 : f32
    %49 = vector.broadcast %cst_12 : f32 to vector<8x1xf32>
    %50 = arith.select %48, %42, %49 : vector<8x1xi1>, vector<8x1xf32>
    %c0_13 = arith.constant 0 : index
    %c0_14 = arith.constant 0 : index
    %51 = vector.load %arg3[%c0_13, %c0_14] : memref<8x1xf32, #tpu.memory_space<vmem>>, vector<8x1xf32>
    tpu.vector_store %arg3[%c0_13, %c0_14], %50 {strides = array<i32>} : memref<8x1xf32, #tpu.memory_space<vmem>>, vector<8x1xf32>,
    return
  }
  func.func @transform_0(%arg0: i32) -> (i32, i32) {
    %c0_i32 = arith.constant 0 : i32
    %c0_i32_0 = arith.constant 0 : i32
    return %arg0, %c0_i32 : i32, i32
  }
  func.func @transform_1(%arg0: i32) -> (i32, i32) {
    %c0_i32 = arith.constant 0 : i32
    %c0_i32_0 = arith.constant 0 : i32
    return %arg0, %c0_i32 : i32, i32
  }
  func.func @transform_2(%arg0: i32) -> (i32, i32) {
    %c0_i32 = arith.constant 0 : i32
    %c0_i32_0 = arith.constant 0 : i32
    return %arg0, %c0_i32 : i32, i32
  }
}

</mosaic_0001>

<bundles_post_ra>
// kernel: tpu_custom_call.1
= control target key start
LH: loop header
LB: loop body
LE: loop exit
PB: predicated region body
PF: predicated region fallthrough
CT: control target
= control target key end

     0   :  { %7 = vsyncpa [#allocation3], 0  ;;  %s177_s0 = inlined_call_operand.hbm [shape: f32[8,128], index: 0, kind: input, shape index: {}]   ;;  %s178_s1 = inlined_call_operand.hbm [shape: f32[8,128], index: 1, kind: input, shape index: {}]   ;;  %s179_s2 = inlined_call_operand.vmem [shape: f32[8,1], index: 2, kind: output, shape index: {}]  }
   0x1   :  { %8 = vsyncpa [#allocation5], 0  ;;  %s151_s9 = smov [#allocation2]   ;;  %s152_s11 = smov [#allocation4]  }
   0x2   :  { %s15_s10 = sshll.u32 %s151_s9, 4  ;;  %s25_s12 = sshll.u32 %s152_s11, 4  ;;  %s16_s10 = int_to_ptr.vmem [resolvable:$true] %s15_s10  ;;  %s26_s12 = int_to_ptr.vmem [resolvable:$true] %s25_s12 }
   0x3   :  { %s115_s13 = scalar_lea.vmem %s16_s10, 128  ;;  %p120_p1 = scmp.lt.s32.totalorder %s16_s10, %s16_s10 }
   0x4   :  { %p116_p0 = scmp.ne.s32.totalorder %s16_s10, %s115_s13  ;;  %p121_p2 = scmp.lt.s32.totalorder %s115_s13, %s115_s13 }
   0x6   :  { %p122_p3 = por %p121_p2, %p120_p1 }
   0x8   :  { %p123_p4 = pnand %p122_p3, %p116_p0 }
   0xa   :  { %126 = shalt.err (!%p123_p4)
}
   0xb   :  { %18 = dma.hbm_to_vmem [thread:$0]  %s177_s0, 128, %s16_s10, [#allocation3]  }
   0xc   :  { %s135_s16 = scalar_lea.vmem %s26_s12, 128  ;;  %p140_p6 = scmp.lt.s32.totalorder %s26_s12, %s26_s12 }
   0xd   :  { %p136_p5 = scmp.ne.s32.totalorder %s26_s12, %s135_s16  ;;  %p141_p7 = scmp.lt.s32.totalorder %s135_s16, %s135_s16 }
   0xf   :  { %p142_p8 = por %p141_p7, %p140_p6 }
  0x11   :  { %p143_p9 = pnand %p142_p8, %p136_p5 }
  0x13   :  { %146 = shalt.err (!%p143_p9)
}
  0x14   :  { %28 = dma.hbm_to_vmem [thread:$0]  %s178_s1, 128, %s26_s12, [#allocation5]  }
  0x15   :  { %147 = dma.done.wait [#allocation3], 128  }
  0x16   :  { %148 = vsyncadd [#allocation3], 4294967168 }
  0x17   :  { %149 = dma.done.wait [#allocation5], 128  }
  0x18   :  { %150 = vsyncadd [#allocation5], 4294967168  ;;  %v35_v0 = vld [vmem:[#allocation2] sm:$0xff]  ;;  %v36_v1 = vld [vmem:[#allocation4] sm:$0xff]  ;;  %vm82_vm0 = vcmask 7168  }
  0x19   :  { %37 = vmax.xlane.f32.xlu0 %v35_v0 }
  0x1d   :  { %50 = vmax.xlane.f32.xlu0 %v36_v1 }
  0xa2   :  { %v38_v2 = vpop.xlane.xlu0 %37 }
  0xa3   :  { %v39_v3 = vsub.f32 %v35_v0, %v38_v2 }
  0xa5   :  { %v40_v4 = vmul.f32 1.442695, %v39_v3 }
  0xa6   :  { %v51_v5 = vpop.xlane.xlu0 %50 }
  0xa7   :  { %93 = vpow2.f32 %v40_v4  ;;  %v52_v6 = vsub.f32 %v36_v1, %v51_v5 }
  0xa9   :  { %v53_v7 = vmul.f32 1.442695, %v52_v6 }
  0xab   :  { %95 = vpow2.f32 %v53_v7 }
  0xb4   :  { %v94_v8 = vpop.eup %93 }
  0xb5   :  { %42 = vadd.xlane.f32.xlu1 %v94_v8 }
  0xb8   :  { %v96_v9 = vpop.eup %95 }
  0xb9   :  { %55 = vadd.xlane.f32.xlu1 %v96_v9 }
 0x13e   :  { %v43_v10 = vpop.xlane.xlu1 %42 }
 0x13f   :  { %97 = vrcp.f32 %v43_v10 }
 0x142   :  { %v56_v11 = vpop.xlane.xlu1 %55 }
 0x143   :  { %99 = vrcp.f32 %v56_v11 }
 0x144   :  { %101 = vlog2.f32 %v56_v11 }
 0x145   :  { %103 = vlog2.f32 %v43_v10 }
 0x14c   :  { %v98_v12 = vpop.eup %97 }
 0x14d   :  { %v49_v14 = vmul.f32 %v98_v12, %v94_v8 }
 0x150   :  { %v100_v13 = vpop.eup %99 }
 0x151   :  { %v62_v15 = vmul.f32 %v100_v13, %v96_v9  ;;  %v102_v18 = vpop.eup %101 }
 0x152   :  { %v104_v19 = vpop.eup %103  ;;  %v58_v20 = vmul.f32 0.6931472, %v102_v18 }
 0x153   :  { %v63_v16 = vadd.f32 %v62_v15, %v49_v14  ;;  %v45_v21 = vmul.f32 0.6931472, %v104_v19 }
 0x154   :  { %v59_v22 = vsub.f32 %v52_v6, %v58_v20 }
 0x155   :  { %v64_v17 = vmax.f32 %v63_v16, 1.1754944e-38  ;;  %v46_v23 = vsub.f32 %v39_v3, %v45_v21 }
 0x156   :  { %v69_v26 = vmul.f32 %v62_v15, %v59_v22 }
 0x157   :  { %105 = vlog2.f32 %v64_v17  ;;  %v68_v28 = vmul.f32 %v49_v14, %v46_v23 }
 0x159   :  { %v70_v29 = vadd.f32 %v69_v26, %v68_v28 }
 0x164   :  { %v106_v24 = vpop.eup %105 }
 0x165   :  { %v66_v25 = vmul.f32 0.6931472, %v106_v24 }
 0x167   :  { %v90_v27 = vadd.f32 -0.6931472, %v66_v25 }
 0x169   :  { %v71_v30 = vmul.f32 %v90_v27, %v63_v16 }
 0x16b   :  { %v72_v31 = vsub.f32 %v70_v29, %v71_v30 }
 0x16d   :  { %73 = vadd.xlane.f32.xlu0 %v72_v31 }
 0x1f6   :  { %v74_v32 = vpop.xlane.xlu0 %73 }
 0x1f7   :  { %83 = vst.msk [vmem:[%s179_s2] sm:$0xff] %vm82_vm0, %v74_v32 }
 0x1f8   :  { %88 = vsyncpa [#allocation3], 1 }
 0x1f9   :  { %89 = vsyncpa [#allocation5], 1 }

</bundles_post_ra>
